<compile_context>
chip_gen: v7x
topology: tpu7x:2x2x1
jax: 0.10.0
libtpu: 0.0.40
codegen_flags: <defaults>
</compile_context>

<pallas_src>
import functools

import jax
import jax.numpy as jnp
from jax.experimental import pallas as pl
from jax.experimental.pallas import tpu as pltpu


def _causal_conv1d_kernel(x_ref, w_ref, b_ref, o_ref, carry_ref, *,
                          kernel_size, dilation, time_tile):
    """One (batch, time-tile) step of a causal dilated conv, NCW layout.

    x_ref     : (C_in, TT)        current input time tile (time on lanes)
    w_ref     : (C_out, K*C_in)   taps flattened into the contraction dim
    b_ref     : (C_out, 1)        bias
    o_ref     : (C_out, TT)       output tile (lane-dense time)
    carry_ref : (C_in, pad)       last `pad` timesteps of the previous tile
    """
    c_in = x_ref.shape[0]
    pad = (kernel_size - 1) * dilation
    j = pl.program_id(1)

    x_tile = x_ref[...]

    if pad > 0:
        # Causal left zero-padding: zero the carry at the start of each batch row.
        @pl.when(j == 0)
        def _():
            carry_ref[...] = jnp.zeros_like(carry_ref)

        combined = jnp.concatenate([carry_ref[...], x_tile], axis=1)  # (C_in, pad+TT)
    else:
        combined = x_tile

    w = w_ref[...]

    if kernel_size == 1:
        acc = jnp.dot(w, combined, preferred_element_type=jnp.float32)
    elif c_in < 128:
        # im2col over taps: ONE MXU matmul with contraction depth K*C_in.
        xcat = jnp.concatenate(
            [combined[:, k * dilation:k * dilation + time_tile]
             for k in range(kernel_size)],
            axis=0)                                        # (K*C_in, TT)
        acc = jnp.dot(w, xcat, preferred_element_type=jnp.float32)
    else:
        # Channels already fill the MXU depth: unrolled per-tap accumulation.
        acc = jnp.zeros(o_ref.shape, jnp.float32)
        for k in range(kernel_size):
            tap = combined[:, k * dilation:k * dilation + time_tile]
            wk = w[:, k * c_in:(k + 1) * c_in]
            acc = acc + jnp.dot(wk, tap, preferred_element_type=jnp.float32)

    # Epilogue (bias add) stays in f32, then cast once to the output dtype.
    o_ref[...] = (acc + b_ref[...].astype(jnp.float32)).astype(o_ref.dtype)

    if pad > 0:
        # Carry the most recent `pad` timesteps forward to the next time tile.
        carry_ref[...] = combined[:, time_tile:time_tile + pad]


def causal_conv1d(x_ncw, weight_oik, bias_o, *, dilation=1, time_tile=512):
    """x_ncw: (B, C_in, T); weight_oik: (C_out, C_in, K); bias_o: (C_out,)."""
    B, C_in, T = x_ncw.shape
    C_out, C_in_w, K = weight_oik.shape
    assert C_in_w == C_in
    pad = (K - 1) * dilation

    # Lane-dense time tile: either the full T or a multiple of 128.
    if T <= time_tile:
        TT = T
    else:
        TT = max(128, (time_tile // 128) * 128)
    num_t = pl.cdiv(T, TT)

    # Tiny parameter reshapes only (no HBM-scale passes over activations):
    # (C_out, C_in, K) -> (C_out, K*C_in), ordered [tap0 chans | tap1 chans | ...].
    w_flat = jnp.transpose(weight_oik, (0, 2, 1)).reshape(C_out, K * C_in)
    b_col = bias_o.reshape(C_out, 1)

    kernel = functools.partial(
        _causal_conv1d_kernel, kernel_size=K, dilation=dilation, time_tile=TT)

    carry_cols = max(pad, 1)

    out = pl.pallas_call(
        kernel,
        out_shape=jax.ShapeDtypeStruct((B, C_out, T), x_ncw.dtype),
        grid_spec=pltpu.PrefetchScalarGridSpec(
            num_scalar_prefetch=0,
            grid=(B, num_t),
            in_specs=[
                # Non-overlapping, aligned input time tiles (halo comes from carry).
                pl.BlockSpec((pl.Squeezed(), C_in, TT), lambda b, j: (b, 0, j)),
                # Weights / bias: single resident block, never re-fetched.
                pl.BlockSpec((C_out, K * C_in), lambda b, j: (0, 0)),
                pl.BlockSpec((C_out, 1), lambda b, j: (0, 0)),
            ],
            out_specs=pl.BlockSpec((pl.Squeezed(), C_out, TT), lambda b, j: (b, 0, j)),
            scratch_shapes=[pltpu.VMEM((C_in, carry_cols), x_ncw.dtype)],
        ),
        compiler_params=pltpu.CompilerParams(
            dimension_semantics=("parallel", "arbitrary"),
        ),
    )(x_ncw, w_flat, b_col)
    return out


def _reference(x, weight, bias, dilation):
    K = weight.shape[-1]
    return jax.lax.conv_general_dilated(
        x, weight,
        window_strides=(1,),
        padding=[((K - 1) * dilation, 0)],
        rhs_dilation=(dilation,),
        dimension_numbers=("NCH", "OIH", "NCH"),
    ) + bias[None, :, None]


if __name__ == "__main__":
    key = jax.random.PRNGKey(0)

    # --- Test 1: small shapes consistent with the module defaults -----------
    B, C_in, C_out, T = 2, 4, 8, 16
    kernel_size, dilation = 2, 2
    kx, kw, kb, key = jax.random.split(key, 4)
    x = jax.random.normal(kx, (B, C_in, T), dtype=jnp.float32)
    fan_in = C_in * kernel_size
    bound = 1.0 / (fan_in ** 0.5)
    weight = jax.random.uniform(kw, (C_out, C_in, kernel_size), jnp.float32, -bound, bound)
    bias = jax.random.uniform(kb, (C_out,), jnp.float32, -bound, bound)

    out = jax.block_until_ready(causal_conv1d(x, weight, bias, dilation=dilation))
    ref = _reference(x, weight, bias, dilation)
    assert out.shape == (B, C_out, T)
    assert jnp.allclose(out, ref, atol=1e-5, rtol=1e-5)

    # --- Test 2: multi time-tile path (exercises the carry / halo logic) ----
    B2, C_in2, C_out2, T2 = 2, 8, 16, 384
    K2, d2 = 2, 4
    kx2, kw2, kb2, key = jax.random.split(key, 4)
    x2 = jax.random.normal(kx2, (B2, C_in2, T2), dtype=jnp.float32)
    bound2 = 1.0 / ((C_in2 * K2) ** 0.5)
    w2 = jax.random.uniform(kw2, (C_out2, C_in2, K2), jnp.float32, -bound2, bound2)
    b2 = jax.random.uniform(kb2, (C_out2,), jnp.float32, -bound2, bound2)

    out2 = jax.block_until_ready(
        causal_conv1d(x2, w2, b2, dilation=d2, time_tile=128))
    ref2 = _reference(x2, w2, b2, d2)
    assert out2.shape == (B2, C_out2, T2)
    assert jnp.allclose(out2, ref2, atol=1e-5, rtol=1e-5)

    print("KERNEL_OK")
</pallas_src>

<mosaic_0001>
module attributes {stable_mosaic.version = 11 : i64} {
  func.func @_causal_conv1d_kernel(%arg0: i32, %arg1: i32, %arg2: memref<1x4x16xf32, #tpu.memory_space<vmem>>, %arg3: memref<8x8xf32, #tpu.memory_space<vmem>>, %arg4: memref<8x1xf32, #tpu.memory_space<vmem>>, %arg5: memref<1x8x16xf32, #tpu.memory_space<vmem>>, %arg6: memref<4x2xf32, #tpu.memory_space<vmem>>) attributes {dimension_semantics = [#tpu.dimension_semantics<parallel>, #tpu.dimension_semantics<arbitrary>], iteration_bounds = array<i64: 2, 1>, scalar_prefetch = 0 : i64, scratch_operands = 1 : i64, tpu.core_type = #tpu.core_type<tc>, window_params = [{transform_indices = @transform_0, window_bounds = array<i64: 1, 4, 16>}, {pipeline_mode = #tpu.pipeline_mode<synchronous>, transform_indices = @transform_1, window_bounds = array<i64: 8, 8>}, {pipeline_mode = #tpu.pipeline_mode<synchronous>, transform_indices = @transform_2, window_bounds = array<i64: 8, 1>}, {transform_indices = @transform_3, window_bounds = array<i64: 1, 8, 16>}]} {
    %c0 = arith.constant 0 : index
    %c0_0 = arith.constant 0 : index
    %c0_1 = arith.constant 0 : index
    %0 = vector.load %arg2[%c0, %c0_0, %c0_1] : memref<1x4x16xf32, #tpu.memory_space<vmem>>, vector<1x4x16xf32>
    %1 = vector.shape_cast %0 : vector<1x4x16xf32> to vector<4x16xf32>
    %c0_i32 = arith.constant 0 : i32
    %2 = arith.cmpi eq, %arg1, %c0_i32 : i32
    %3 = arith.extui %2 : i1 to i32
    %c0_i32_2 = arith.constant 0 : i32
    %4 = arith.cmpi ne, %3, %c0_i32_2 : i32
    scf.if %4 {
      %cst_14 = arith.constant 0.000000e+00 : f32
      %20 = vector.broadcast %cst_14 : f32 to vector<4x2xf32>
      %c0_15 = arith.constant 0 : index
      %c0_16 = arith.constant 0 : index
      %21 = vector.load %arg6[%c0_15, %c0_16] : memref<4x2xf32, #tpu.memory_space<vmem>>, vector<4x2xf32>
      tpu.vector_store %arg6[%c0_15, %c0_16], %20 {strides = array<i32>} : memref<4x2xf32, #tpu.memory_space<vmem>>, vector<4x2xf32>,
    } else {
    }
    %c0_3 = arith.constant 0 : index
    %c0_4 = arith.constant 0 : index
    %5 = vector.load %arg6[%c0_3, %c0_4] : memref<4x2xf32, #tpu.memory_space<vmem>>, vector<4x2xf32>
    %6 = tpu.concatenate %5, %1 in 1 : vector<4x2xf32>, vector<4x16xf32> -> vector<4x18xf32>
    %c0_5 = arith.constant 0 : index
    %c0_6 = arith.constant 0 : index
    %7 = vector.load %arg3[%c0_5, %c0_6] : memref<8x8xf32, #tpu.memory_space<vmem>>, vector<8x8xf32>
    %8 = vector.extract_strided_slice %6 {offsets = [0, 0], sizes = [4, 16], strides = [1, 1]} : vector<4x18xf32> to vector<4x16xf32>
    %9 = vector.extract_strided_slice %6 {offsets = [0, 2], sizes = [4, 16], strides = [1, 1]} : vector<4x18xf32> to vector<4x16xf32>
    %10 = tpu.concatenate %8, %9 in 0 : vector<4x16xf32>, vector<4x16xf32> -> vector<8x16xf32>
    %cst = arith.constant dense<0.000000e+00> : vector<8x16xf32>
    %11 = tpu.matmul %7, %10, %cst {dimension_numbers = #tpu.dot_dimension_numbers<[1], [0], [0], [1], [0, 0, 1, 1], [], []>} : vector<8x8xf32>, vector<8x16xf32>, vector<8x16xf32> -> vector<8x16xf32>
    %c0_7 = arith.constant 0 : index
    %c0_8 = arith.constant 0 : index
    %12 = vector.load %arg4[%c0_7, %c0_8] : memref<8x1xf32, #tpu.memory_space<vmem>>, vector<8x1xf32>
    %13 = vector.broadcast %12 : vector<8x1xf32> to vector<8x16xf32>
    %14 = arith.addf %11, %13 : vector<8x16xf32>
    %c0_9 = arith.constant 0 : index
    %c0_10 = arith.constant 0 : index
    %c0_11 = arith.constant 0 : index
    %15 = vector.load %arg5[%c0_9, %c0_10, %c0_11] : memref<1x8x16xf32, #tpu.memory_space<vmem>>, vector<1x8x16xf32>
    %16 = vector.shape_cast %15 : vector<1x8x16xf32> to vector<8x16xf32>
    %17 = vector.shape_cast %14 : vector<8x16xf32> to vector<1x8x16xf32>
    tpu.vector_store %arg5[%c0_9, %c0_10, %c0_11], %17 {strides = array<i32>} : memref<1x8x16xf32, #tpu.memory_space<vmem>>, vector<1x8x16xf32>,
    %18 = vector.extract_strided_slice %6 {offsets = [0, 16], sizes = [4, 2], strides = [1, 1]} : vector<4x18xf32> to vector<4x2xf32>
    %c0_12 = arith.constant 0 : index
    %c0_13 = arith.constant 0 : index
    %19 = vector.load %arg6[%c0_12, %c0_13] : memref<4x2xf32, #tpu.memory_space<vmem>>, vector<4x2xf32>
    tpu.vector_store %arg6[%c0_12, %c0_13], %18 {strides = array<i32>} : memref<4x2xf32, #tpu.memory_space<vmem>>, vector<4x2xf32>,
    return
  }
  func.func @transform_0(%arg0: i32, %arg1: i32) -> (i32, i32, i32) {
    %c0_i32 = arith.constant 0 : i32
    %c0_i32_0 = arith.constant 0 : i32
    return %arg0, %c0_i32, %arg1 : i32, i32, i32
  }
  func.func @transform_1(%arg0: i32, %arg1: i32) -> (i32, i32) {
    %c0_i32 = arith.constant 0 : i32
    %c0_i32_0 = arith.constant 0 : i32
    %c0_i32_1 = arith.constant 0 : i32
    return %c0_i32, %c0_i32_0 : i32, i32
  }
  func.func @transform_2(%arg0: i32, %arg1: i32) -> (i32, i32) {
    %c0_i32 = arith.constant 0 : i32
    %c0_i32_0 = arith.constant 0 : i32
    %c0_i32_1 = arith.constant 0 : i32
    return %c0_i32, %c0_i32_0 : i32, i32
  }
  func.func @transform_3(%arg0: i32, %arg1: i32) -> (i32, i32, i32) {
    %c0_i32 = arith.constant 0 : i32
    %c0_i32_0 = arith.constant 0 : i32
    return %arg0, %c0_i32, %arg1 : i32, i32, i32
  }
}

</mosaic_0001>

<bundles_post_ra>
// kernel: tpu_custom_call.1
= control target key start
LH: loop header
LB: loop body
LE: loop exit
PB: predicated region body
PF: predicated region fallthrough
CT: control target
= control target key end

     0   :  { %8 = vsyncpa [#allocation4], 0  ;;  %s801_s0 = inlined_call_operand.vmem [shape: f32[2,4,16], index: 0, kind: input, shape index: {}]   ;;  %s802_s1 = inlined_call_operand.hbm [shape: f32[8,8], index: 1, kind: input, shape index: {}]   ;;  %s803_s2 = inlined_call_operand.vmem [shape: f32[8,1], index: 2, kind: input, shape index: {}]   ;;  %s804_s3 = inlined_call_operand.hbm [shape: f32[2,8,16], index: 3, kind: output, shape index: {}]  }
   0x1   :  { %9 = vsyncpa [#allocation5], 0 }
   0x2   :  { %11 = vsyncpa [#allocation5 + $0x1], 0  ;;  %s646_s12 = smov 0   ;;  %s648_s13 = smov 0  }
   0x3   :  { %s650_s14 = smov 0   ;;  %s652_s15 = smov 0  }
   0x4   :  { %s654_s16 = smov 0   ;;  %s656_s17 = smov 0  }
   0x5 LB: > { %s411_s18 = sadd.s32 4294967295, %s616_s17   ;;  %s412_s19 = sadd.s32 4294967294, %s616_s17   ;;  %s616_s17 = sphi %s656_s17, %s17_s17   ;;  %s612_s16 = sphi %s654_s16, %s822_s16   ;;  %s608_s15 = sphi %s652_s15, %s821_s15   ;;  %s604_s14 = sphi %s650_s14, %s820_s14   ;;  %s600_s13 = sphi %s648_s13, %s819_s13   ;;  %s596_s12 = sphi %s646_s12, %s818_s12  }
   0x6   : > { %s29_s20 = sadd.s32 1, %s612_s16  ;;  %s108_s21 = sadd.s32 1, %s604_s14 }
   0x7   : > { %p31_p0 = scmp.ge.s32.totalorder %s29_s20, 2  ;;  %p118_p1 = scmp.ne.s32.totalorder %s604_s14, %s600_s13 }
   0x8   : > { %p119_p2 = scmp.eq.s32.totalorder %s411_s18, 1  ;;  %p124_p3 = scmp.ne.s32.totalorder %s600_s13, %s596_s12 }
   0x9   : > { %s824_s20 = smov (%p31_p0, %s29_s20), 0  ;;  %p125_p5 = scmp.eq.s32.totalorder %s412_s19, 1 }
   0xa   : > { %p686_p4 = por %p119_p2, %p118_p1  ;;  %s103_s23 = ssub.s32 %s612_s16, %s824_s20 }
   0xb   : > { %p413_p6 = scmp.ge.s32.totalorder %s616_s17, 1  ;;  %p106_p7 = scmp.eq.s32.totalorder %s103_s23, 0 }
   0xc   : > { %s809_s22 = scalar_select %p686_p4, 1, 0 }
   0xd   : > { %p693_p8 = por %p125_p5, %p124_p3  ;;  %p132_p9 = scmp.lt.s32.totalorder %s616_s17, 3 }
   0xe   : > { %s699_s25 = scalar_select %p106_p7, %s604_s14, %s108_s21  }
   0xf   : > { %s810_s24 = scalar_select %p693_p8, 1, 0 }
  0x10   : > { %p701_p10 = pnand %p413_p6, %p132_p9  ;;  %p705_p11 = scmp.eq.s32.totalorder %s411_s18, 0 }
  0x11   : > { %s618_s28 = smov [#allocation3]   ;;  %s506_s6 = scalar_lea.hbm %s802_s1, 128 }
  0x12   : > { %s811_s26 = scalar_select %p701_p10, 1, 0 }
  0x13   : > { %s812_s27 = scalar_select %p705_p11, 1, 0 }
  0x14   : > { %p438_p12 = pneg %p701_p10  ;;  %s145_s29 = sshll.u32 %s618_s28, 4  ;;  %s146_s29 = int_to_ptr.vmem [resolvable:$true] %s145_s29 }
  0x15   : > { %p507_p0 = scmp.ne.s32.totalorder %s802_s1, %s506_s6  ;;  %p513_p5 = scmp.lt.u32.totalorder %s506_s6, %s802_s1 }
  0x16   : > { %p713_p13 = pnand %p705_p11, %p438_p12 }
  0x18   : > { %p508_p1 = pneg %p713_p13 }
  0x1a   : > { %p509_p2 = pnand %p508_p1, %p507_p0 }
  0x1c   : > { %p510_p3 = pneg %p509_p2 }
  0x1e   : > { %p515_p6 = pnand %p513_p5, %p510_p3 }
  0x20   : > { %518 = shalt.err (!%p515_p6)
}
  0x21   : > { %s519_s11 = scalar_lea.vmem %s146_s29, 128  ;;  %p527_p8 = scmp.lt.s32.totalorder %s146_s29, %s146_s29 }
  0x22   : > { %p520_p7 = scmp.ne.s32.totalorder %s146_s29, %s519_s11  ;;  %p528_p4 = scmp.lt.s32.totalorder %s519_s11, %s519_s11 }
  0x24   : > { %p522_p9 = pnand %p520_p7, %p508_p1  ;;  %p529_p11 = por %p528_p4, %p527_p8 }
  0x26   : > { %p523_p12 = pneg %p522_p9 }
  0x28   : > { %p530_p10 = pnand %p529_p11, %p523_p12 }
  0x2a   : > { %533 = shalt.err (!%p530_p10)
}
  0x2b   : > { %441 = dma.hbm_to_vmem [thread:$0]  (!%p713_p13), %s802_s1, 128, %s146_s29, [#allocation4]  }
  0x2c   : > { %p814_p0 = scmp.ne.s32.totalorder %s811_s26, 0 }
  0x2d   : > { %p815_p2 = scmp.ne.s32.totalorder (!%p814_p0), %s812_s27, 0 }
  0x2e   : > { %171 = sbr.rel (%p814_p0) target bundleno = 524 (0x20c), region = 32 }
  0x35   : > { %587 = dma.done.wait (%p815_p2), [#allocation4], 128  }
  0x36   : > { %589 = vsyncadd (%p815_p2), [#allocation4], 4294967168  ;;  %vm209_vm0 = vcmask 11264   ;;  %p197_p4 = scmp.lt.s32.totalorder %s608_s15, 1  ;;  %v619_v0 = vmov 0.0   ;;  %v620_v1 = vmov 0  }
  0x37   : > { %210 = vst.msk [vmem:[#allocation2] sm:$0xf] %vm209_vm0, %v619_v0  ;;  %427 = vmatprep.subr.mxu0 %v619_v0  ;;  %504 = vset.pattern.permute.xlu1 %v620_v1  ;;  %v226_v3 = vld [vmem:[%s803_s2] sm:$0xff]  ;;  %s621_s4 = smov 2   ;;  %vm622_vm1 = vmmov 0   ;;  %vm216_vm2 = vcmask 15360  }
  0x38   : > { %s198_s21 = scalar_select %p197_p4, %s608_s15, 1  ;;  %505 = vset.pattern.permute.xlu0 %v620_v1  ;;  %229 = vperm.xlu1 %504, %v226_v3   ;;  %vm224_vm3 = vcmask 1043456   ;;  %v218_v11 = vld [vmem:[#allocation3] sm:$0xff]  ;;  %vm232_vm4 = vcmask 64512   ;;  %vm306_vm5 = vcmask 130048  }
  0x39   : > { %429 = vmatprep.mubr.msk.f32.mxu0 %vm622_vm1, %v619_v0  ;;  %s623_s5 = smov 112   ;;  %s624_s6 = smov 126  }
  0x3a   : > { %s419_s23 = sshll.u32 %s198_s21, 2  ;;  %s194_s7 = sand.u32 1, %s600_s13  }
  0x3b   : > { %s203_s29 = scalar_lea.vmem %s801_s0, %s419_s23  ;;  %s418_s8 = sshll.u32 %s194_s7, 3 }
  0x3c   : > { %v204_v2 = vld [vmem:[%s203_s29] sm:$0xf]  ;;  %s422_s9 = sshll.u32 %s608_s15, 7  ;;  %s196_s10 = scalar_lea.vmem [#allocation6], %s418_s8 }
  0x3d   : > { %213 = vrot.lane.b32.xlu0 %v204_v2, %s621_s4  ;;  %s328_s11 = sshll.u32 %s196_s10, 4  ;;  %s754_s21 = scalar_lea.hbm %s804_s3, %s422_s9  ;;  %s756_s11 = int_to_ptr.vmem [resolvable:$true] %s328_s11 }
  0x3e   : > { %v211_v4 = vld [vmem:[#allocation2] sm:$0xf]  ;;  %s314_s23 = scalar_lea.sflag [#allocation5], %s194_s7  ;;  %s534_s26 = scalar_lea.vmem %s756_s11, 128 }
  0x3f   : > { %p535_p8 = scmp.ne.s32.totalorder %s756_s11, %s534_s26  ;;  %p816_p10 = scmp.ne.s32.totalorder %s809_s22, 0 }
  0x40   : > { %s625_s15 = smov [#allocation6]  }
  0x41   : > { %p536_p11 = pnand %p535_p8, %p816_p10  ;;  %s538_s28 = sshll.u32 %s625_s15, 4  ;;  %s539_s28 = int_to_ptr.vmem [resolvable:$false] %s538_s28 }
  0x42   : > { %s540_s29 = scalar_lea.vmem %s539_s28, 256  ;;  %p541_p1 = scmp.lt.s32.totalorder %s756_s11, %s539_s28 }
  0x43   : > { %p537_p13 = pneg %p536_p11  ;;  %p542_p3 = scmp.lt.s32.totalorder %s540_s29, %s534_s26 }
  0x45   : > { %p543_p5 = por %p542_p3, %p541_p1 }
  0x47   : > { %p544_p6 = pnand %p543_p5, %p537_p13 }
  0xaf   : > { %v214_v5 = vpop.permute.xlu0 %213 }
  0xb0   : > { %v217_v6 = vsel %vm216_vm2, %v211_v4, %v214_v5 }
  0xb1   : > { %308 = vrot.lane.b32.xlu1 %v217_v6, %s623_s5  ;;  %v220_v7 = vrot.slane %v217_v6, 4 }
  0xb3   : > { %221 = vrot.lane.b32.xlu0 %v220_v7, %s624_s6 }
  0xb7   : > { %v230_v8 = vpop.permute.xlu1 %229 }
 0x123   : > { %v309_v9 = vpop.permute.xlu1 %308 }
 0x124   : > { %312 = vst.msk [vmem:[#allocation2] sm:$0xf] %vm209_vm0, %v309_v9 }
 0x125   : > { %v222_v10 = vpop.permute.xlu0 %221 }
 0x126   : > { %v225_v12 = vsel %vm224_vm3, %v217_v6, %v222_v10 }
 0x127   : > { %428 = vmatpush3.msra.mxu0 %v225_v12 }
 0x128   : > { %430 = vmatmul.mubr.msk.f32.vlgmr.msra.gmra.mrb[0].mxu0 %vm232_vm4, %v218_v11 }
 0x1fb   : > { %v302_v13 = vpop.f32.mrb[0].mxu0 }
 0x1fc   : > { %v303_v14 = vadd.f32 %v302_v13, %v230_v8  ;;  %v431_v15 = vpop.f32.mrb[1].mxu0 }
 0x1fe   : > { %307 = vst.msk [vmem:[%s196_s10] sm:$0xff] %vm306_vm5, %v303_v14 }
 0x1ff   : > { %547 = shalt.err (!%p544_p6)
}
 0x200   : > { %s548_s27 = scalar_lea.hbm %s754_s21, 128  ;;  %s552_s5 = scalar_lea.hbm %s804_s3, 256 }
 0x201   : > { %p549_p7 = scmp.ne.s32.totalorder %s754_s21, %s548_s27  ;;  %p553_p0 = scmp.lt.u32.totalorder %s754_s21, %s804_s3 }
 0x202   : > { %p554_p2 = scmp.lt.u32.totalorder %s552_s5, %s548_s27  ;;  %p556_p8 = scmp.lt.u32.totalorder %s548_s27, %s754_s21 }
 0x203   : > { %p550_p9 = pnand %p549_p7, %p816_p10 }
 0x204   : > { %p555_p4 = por %p554_p2, %p553_p0 }
 0x205   : > { %p551_p12 = pneg %p550_p9 }
 0x206   : > { %p557_p11 = por %p556_p8, %p555_p4 }
 0x208   : > { %p558_p13 = pnand %p557_p11, %p551_p12 }
 0x20a   : > { %561 = shalt.err (!%p558_p13)
}
 0x20b   : > { %436 = dma.vmem_to_hbm [thread:$0]  (%p816_p10), %s756_s11, 128, %s754_s21, %s314_s23  }
 0x20c PF: > { %p448_p1 = scmp.ge.s32.totalorder %s616_s17, 2  ;;  %s340_s8 = sand.u32 1, %s596_s12  }
 0x20d   : > { %p817_p3 = scmp.ne.s32.totalorder %s810_s24, 0  ;;  %s341_s9 = scalar_lea.sflag [#allocation5], %s340_s8 }
 0x20f   : > { %p443_p5 = pnand %p448_p1, %p817_p3 }
 0x211   : > { %591 = dma.done.wait (!%p443_p5), %s341_s9, 128  }
 0x212   : > { %593 = vsyncadd (!%p443_p5), %s341_s9, 4294967168  ;;  %s17_s17 = sadd.s32 1, %s616_s17   ;;  %s818_s12 = smov %s600_s13 }
 0x213   : > { %p14_p6 = scmp.ge.s32.totalorder %s17_s17, 4   ;;  %s819_s13 = smov %s604_s14 }
 0x214   : > { %s820_s14 = smov %s699_s25  ;;  %s821_s15 = smov %s612_s16 }
 0x215   : > { %s822_s16 = smov %s824_s20  ;;  %16 = sbr.rel (!%p14_p6) target bundleno = 5 (0x5), region = 76 }
 0x21c   :  { %346 = vsyncpa [#allocation4], 1 }
 0x21d   :  { %348 = vsyncpa [#allocation4 + $0x1], 1 }
 0x21e   :  { %349 = vsyncpa [#allocation5], 1 }
 0x21f   :  { %351 = vsyncpa [#allocation5 + $0x1], 1 }

</bundles_post_ra>
